<compile_context>
chip_gen: v6e
topology: v6e:2x2x1
jax: 0.10.0
libtpu: 0.0.40
codegen_flags: <defaults>
</compile_context>

<pallas_src>
import numpy as np
import jax
import jax.numpy as jnp
from jax.experimental import pallas as pl
from jax.experimental.pallas import tpu as pltpu

_RGB_W = (0.299, 0.587, 0.114)
_HALO = 8      # row halo held in the scratch (sublane aligned)
_LOFF = 128    # lane-aligned column offset of the image inside the scratch


def gauss_kernel_1d(sigma: float, size: int) -> np.ndarray:
    """Replicates cv2.getGaussianKernel(size, sigma) for sigma > 0."""
    assert sigma > 0 and size >= 1
    xs = np.arange(size, dtype=np.float64) - (size - 1) * 0.5
    k = np.exp(-(xs ** 2) / (2.0 * sigma ** 2))
    return k / k.sum()


def _gray(ref):
    # ref: (3, rows, W) block -> (rows, W) grayscale
    return ref[0] * _RGB_W[0] + ref[1] * _RGB_W[1] + ref[2] * _RGB_W[2]


def _make_kernel(w1d, offs, TH, W, nh, has_halo):
    lpad = -min(offs)           # K // 2
    rpad = max(offs)            # K - 1 - K // 2
    hext = TH + 2 * _HALO

    def body(x_ref, top_ref, bot_ref, out_ref, ext_ref, hp_ref):
        h = pl.program_id(1)

        # RGB -> gray for the main row block (kept as a value for |g - blur|).
        g = _gray(x_ref)                                            # (TH, W)

        # Gray rows at aligned offsets: row 8 (sublane), column 128 (lane).
        ext_ref[_HALO:_HALO + TH, _LOFF:_LOFF + W] = g

        # Row halos: real neighbour rows, or zeros at the image boundary.
        if has_halo:
            @pl.when(h == 0)
            def _():
                ext_ref[0:_HALO, _LOFF:_LOFF + W] = jnp.zeros((_HALO, W), jnp.float32)

            @pl.when(h > 0)
            def _():
                ext_ref[0:_HALO, _LOFF:_LOFF + W] = _gray(top_ref)

            @pl.when(h == nh - 1)
            def _():
                ext_ref[_HALO + TH:, _LOFF:_LOFF + W] = jnp.zeros((_HALO, W), jnp.float32)

            @pl.when(h < nh - 1)
            def _():
                ext_ref[_HALO + TH:, _LOFF:_LOFF + W] = _gray(bot_ref)
        else:
            ext_ref[0:_HALO, _LOFF:_LOFF + W] = jnp.zeros((_HALO, W), jnp.float32)
            ext_ref[_HALO + TH:, _LOFF:_LOFF + W] = jnp.zeros((_HALO, W), jnp.float32)

        # Zero only the narrow column strips the horizontal taps touch
        # (no wholesale zero-fill of the padded scratch).
        if lpad > 0:
            ext_ref[:, _LOFF - lpad:_LOFF] = jnp.zeros((hext, lpad), jnp.float32)
        if rpad > 0:
            ext_ref[:, _LOFF + W:_LOFF + W + rpad] = jnp.zeros((hext, rpad), jnp.float32)

        # Separable Gaussian, pass 1: horizontal 1-D filter (lane-offset reads).
        hp = jnp.zeros((hext, W), jnp.float32)
        for w, dx in zip(w1d, offs):
            hp = hp + w * ext_ref[:, _LOFF + dx:_LOFF + dx + W]
        hp_ref[...] = hp

        # Pass 2: vertical 1-D filter (cheap sublane-offset reads).
        blur = jnp.zeros((TH, W), jnp.float32)
        for w, dy in zip(w1d, offs):
            blur = blur + w * hp_ref[_HALO + dy:_HALO + dy + TH, :]

        out_ref[0] = jnp.abs(g - blur)

    if has_halo:
        return body

    def body_no_halo(x_ref, out_ref, ext_ref, hp_ref):
        return body(x_ref, None, None, out_ref, ext_ref, hp_ref)

    return body_no_halo


def _pick_tile_h(H, W):
    """Largest multiple-of-8 divisor of H keeping a row block <= ~1 MiB f32."""
    if H % 8 != 0:
        return H                      # odd height: whole image per step
    target = max(8, min(512, ((256 * 1024) // max(W, 1)) // 8 * 8))
    cands = [d for d in range(8, H + 1, 8) if H % d == 0 and d <= target]
    return max(cands) if cands else H


def high_frequency_gauss_blur(x, sigma: float = 1.0, kernel_size: int = 5,
                              tile_h=None):
    """x: (N, 3, H, W) float32 -> (N, 1, H, W) float32 = |gray - blur(gray)|."""
    x = jnp.asarray(x, jnp.float32)
    N, C, H, W = x.shape
    assert C == 3, "convert_gray=True requires 3 input channels"
    assert kernel_size >= 1

    k1d = gauss_kernel_1d(sigma, kernel_size)
    w1d = [float(v) for v in k1d]
    offs = [i - kernel_size // 2 for i in range(kernel_size)]  # matches torch pad=K//2 + crop
    lpad, rpad = -min(offs), max(offs)
    assert lpad <= _HALO and rpad <= _HALO, "kernel_size too large for the fixed 8-row halo"

    TH = _pick_tile_h(H, W) if tile_h is None else int(tile_h)
    assert H % TH == 0 and (TH == H or TH % 8 == 0), "invalid tile_h"
    nh = H // TH
    has_halo = nh > 1

    in_specs = [pl.BlockSpec((None, C, TH, W), lambda n, h: (n, 0, h, 0))]
    inputs = [x]
    if has_halo:
        bpt = TH // _HALO            # 8-row blocks per tile
        nrb = H // _HALO             # 8-row blocks in the image
        in_specs.append(pl.BlockSpec(
            (None, C, _HALO, W),
            lambda n, h: (n, 0, jnp.maximum(h * bpt - 1, 0), 0)))
        in_specs.append(pl.BlockSpec(
            (None, C, _HALO, W),
            lambda n, h: (n, 0, jnp.minimum((h + 1) * bpt, nrb - 1), 0)))
        inputs += [x, x]

    kern = _make_kernel(w1d, offs, TH, W, nh, has_halo)
    hext = TH + 2 * _HALO
    wext = _LOFF + W + rpad

    return pl.pallas_call(
        kern,
        out_shape=jax.ShapeDtypeStruct((N, 1, H, W), jnp.float32),
        grid_spec=pltpu.PrefetchScalarGridSpec(
            num_scalar_prefetch=0,
            grid=(N, nh),
            in_specs=in_specs,
            out_specs=pl.BlockSpec((None, 1, TH, W), lambda n, h: (n, 0, h, 0)),
            scratch_shapes=[
                pltpu.VMEM((hext, wext), jnp.float32),   # gray + halos (aligned)
                pltpu.VMEM((hext, W), jnp.float32),      # horizontal-pass result
            ],
        ),
        compiler_params=pltpu.CompilerParams(
            dimension_semantics=("parallel", "parallel"),
        ),
    )(*inputs)


def _reference(x_np, sigma, kernel_size):
    """Pure-numpy reference matching the PyTorch forward (conv + crop)."""
    N, C, H, W = x_np.shape
    k1 = gauss_kernel_1d(sigma, kernel_size)
    k2 = np.outer(k1, k1).astype(np.float32)
    gray = (0.299 * x_np[:, 0] + 0.587 * x_np[:, 1] + 0.114 * x_np[:, 2]).astype(np.float32)
    lp = kernel_size // 2
    rp = kernel_size - 1 - lp
    padded = np.pad(gray, ((0, 0), (lp, rp), (lp, rp)))
    blur = np.zeros_like(gray)
    for i in range(kernel_size):
        for j in range(kernel_size):
            blur += k2[i, j] * padded[:, i:i + H, j:j + W]
    return np.abs(gray - blur)[:, None, :, :]


if __name__ == "__main__":
    key = jax.random.PRNGKey(0)
    key1, key2 = jax.random.split(key)

    # Case 1: small image, whole (16x16) image in a single row tile.
    x1 = jax.random.uniform(key1, (2, 3, 16, 16), dtype=jnp.float32)
    out1 = jax.block_until_ready(high_frequency_gauss_blur(x1, sigma=1.0, kernel_size=5))
    ref1 = _reference(np.asarray(x1), 1.0, 5)
    assert out1.shape == (2, 1, 16, 16)
    np.testing.assert_allclose(np.asarray(out1), ref1, rtol=1e-4, atol=1e-5)

    # Case 2: row-tiled path with 8-row tiles and halo blocks.
    x2 = jax.random.uniform(key2, (2, 3, 32, 16), dtype=jnp.float32)
    out2 = jax.block_until_ready(
        high_frequency_gauss_blur(x2, sigma=1.5, kernel_size=5, tile_h=8))
    ref2 = _reference(np.asarray(x2), 1.5, 5)
    assert out2.shape == (2, 1, 32, 16)
    np.testing.assert_allclose(np.asarray(out2), ref2, rtol=1e-4, atol=1e-5)

    print("KERNEL_OK")
</pallas_src>

<mosaic_0001>
module attributes {stable_mosaic.version = 11 : i64} {
  func.func @body_no_halo(%arg0: i32, %arg1: i32, %arg2: memref<1x3x16x16xf32, #tpu.memory_space<vmem>>, %arg3: memref<1x1x16x16xf32, #tpu.memory_space<vmem>>, %arg4: memref<32x146xf32, #tpu.memory_space<vmem>>, %arg5: memref<32x16xf32, #tpu.memory_space<vmem>>) attributes {dimension_semantics = [#tpu.dimension_semantics<parallel>, #tpu.dimension_semantics<parallel>], iteration_bounds = array<i64: 2, 1>, scalar_prefetch = 0 : i64, scratch_operands = 2 : i64, tpu.core_type = #tpu.core_type<tc>, window_params = [{transform_indices = @transform_0, window_bounds = array<i64: 1, 3, 16, 16>}, {transform_indices = @transform_1, window_bounds = array<i64: 1, 1, 16, 16>}]} {
    %c0 = arith.constant 0 : index
    %c0_0 = arith.constant 0 : index
    %c0_1 = arith.constant 0 : index
    %c0_2 = arith.constant 0 : index
    %0 = vector.load %arg2[%c0, %c0_0, %c0_1, %c0_2] : memref<1x3x16x16xf32, #tpu.memory_space<vmem>>, vector<1x1x16x16xf32>
    %1 = vector.shape_cast %0 : vector<1x1x16x16xf32> to vector<16x16xf32>
    %cst = arith.constant 2.990000e-01 : f32
    %2 = vector.broadcast %cst : f32 to vector<16x16xf32>
    %3 = arith.mulf %1, %2 : vector<16x16xf32>
    %c0_3 = arith.constant 0 : index
    %c1 = arith.constant 1 : index
    %c0_4 = arith.constant 0 : index
    %c0_5 = arith.constant 0 : index
    %4 = vector.load %arg2[%c0_3, %c1, %c0_4, %c0_5] : memref<1x3x16x16xf32, #tpu.memory_space<vmem>>, vector<1x1x16x16xf32>
    %5 = vector.shape_cast %4 : vector<1x1x16x16xf32> to vector<16x16xf32>
    %cst_6 = arith.constant 5.870000e-01 : f32
    %6 = vector.broadcast %cst_6 : f32 to vector<16x16xf32>
    %7 = arith.mulf %5, %6 : vector<16x16xf32>
    %8 = arith.addf %3, %7 : vector<16x16xf32>
    %c0_7 = arith.constant 0 : index
    %c2 = arith.constant 2 : index
    %c0_8 = arith.constant 0 : index
    %c0_9 = arith.constant 0 : index
    %9 = vector.load %arg2[%c0_7, %c2, %c0_8, %c0_9] : memref<1x3x16x16xf32, #tpu.memory_space<vmem>>, vector<1x1x16x16xf32>
    %10 = vector.shape_cast %9 : vector<1x1x16x16xf32> to vector<16x16xf32>
    %cst_10 = arith.constant 1.140000e-01 : f32
    %11 = vector.broadcast %cst_10 : f32 to vector<16x16xf32>
    %12 = arith.mulf %10, %11 : vector<16x16xf32>
    %13 = arith.addf %8, %12 : vector<16x16xf32>
    %c8 = arith.constant 8 : index
    %c128 = arith.constant 128 : index
    %14 = vector.load %arg4[%c8, %c128] : memref<32x146xf32, #tpu.memory_space<vmem>>, vector<16x16xf32>
    tpu.vector_store %arg4[%c8, %c128], %13 {strides = array<i32>} : memref<32x146xf32, #tpu.memory_space<vmem>>, vector<16x16xf32>,
    %cst_11 = arith.constant 0.000000e+00 : f32
    %15 = vector.broadcast %cst_11 : f32 to vector<8x16xf32>
    %c0_12 = arith.constant 0 : index
    %c128_13 = arith.constant 128 : index
    %16 = vector.load %arg4[%c0_12, %c128_13] : memref<32x146xf32, #tpu.memory_space<vmem>>, vector<8x16xf32>
    tpu.vector_store %arg4[%c0_12, %c128_13], %15 {strides = array<i32>} : memref<32x146xf32, #tpu.memory_space<vmem>>, vector<8x16xf32>,
    %cst_14 = arith.constant 0.000000e+00 : f32
    %17 = vector.broadcast %cst_14 : f32 to vector<8x16xf32>
    %c24 = arith.constant 24 : index
    %c128_15 = arith.constant 128 : index
    %18 = vector.load %arg4[%c24, %c128_15] : memref<32x146xf32, #tpu.memory_space<vmem>>, vector<8x16xf32>
    tpu.vector_store %arg4[%c24, %c128_15], %17 {strides = array<i32>} : memref<32x146xf32, #tpu.memory_space<vmem>>, vector<8x16xf32>,
    %cst_16 = arith.constant 0.000000e+00 : f32
    %19 = vector.broadcast %cst_16 : f32 to vector<32x2xf32>
    %c0_17 = arith.constant 0 : index
    %c126 = arith.constant 126 : index
    %20 = vector.load %arg4[%c0_17, %c126] : memref<32x146xf32, #tpu.memory_space<vmem>>, vector<32x2xf32>
    tpu.vector_store %arg4[%c0_17, %c126], %19 {strides = array<i32>} : memref<32x146xf32, #tpu.memory_space<vmem>>, vector<32x2xf32>,
    %cst_18 = arith.constant 0.000000e+00 : f32
    %21 = vector.broadcast %cst_18 : f32 to vector<32x2xf32>
    %c0_19 = arith.constant 0 : index
    %c144 = arith.constant 144 : index
    %22 = vector.load %arg4[%c0_19, %c144] : memref<32x146xf32, #tpu.memory_space<vmem>>, vector<32x2xf32>
    tpu.vector_store %arg4[%c0_19, %c144], %21 {strides = array<i32>} : memref<32x146xf32, #tpu.memory_space<vmem>>, vector<32x2xf32>,
    %cst_20 = arith.constant 0.000000e+00 : f32
    %23 = vector.broadcast %cst_20 : f32 to vector<32x16xf32>
    %c0_21 = arith.constant 0 : index
    %c126_22 = arith.constant 126 : index
    %24 = vector.load %arg4[%c0_21, %c126_22] : memref<32x146xf32, #tpu.memory_space<vmem>>, vector<32x16xf32>
    %cst_23 = arith.constant 0.054488685 : f32
    %25 = vector.broadcast %cst_23 : f32 to vector<32x16xf32>
    %26 = arith.mulf %25, %24 : vector<32x16xf32>
    %27 = arith.addf %23, %26 : vector<32x16xf32>
    %c0_24 = arith.constant 0 : index
    %c127 = arith.constant 127 : index
    %28 = vector.load %arg4[%c0_24, %c127] : memref<32x146xf32, #tpu.memory_space<vmem>>, vector<32x16xf32>
    %cst_25 = arith.constant 0.244201347 : f32
    %29 = vector.broadcast %cst_25 : f32 to vector<32x16xf32>
    %30 = arith.mulf %29, %28 : vector<32x16xf32>
    %31 = arith.addf %27, %30 : vector<32x16xf32>
    %c0_26 = arith.constant 0 : index
    %c128_27 = arith.constant 128 : index
    %32 = vector.load %arg4[%c0_26, %c128_27] : memref<32x146xf32, #tpu.memory_space<vmem>>, vector<32x16xf32>
    %cst_28 = arith.constant 0.402619958 : f32
    %33 = vector.broadcast %cst_28 : f32 to vector<32x16xf32>
    %34 = arith.mulf %33, %32 : vector<32x16xf32>
    %35 = arith.addf %31, %34 : vector<32x16xf32>
    %c0_29 = arith.constant 0 : index
    %c129 = arith.constant 129 : index
    %36 = vector.load %arg4[%c0_29, %c129] : memref<32x146xf32, #tpu.memory_space<vmem>>, vector<32x16xf32>
    %cst_30 = arith.constant 0.244201347 : f32
    %37 = vector.broadcast %cst_30 : f32 to vector<32x16xf32>
    %38 = arith.mulf %37, %36 : vector<32x16xf32>
    %39 = arith.addf %35, %38 : vector<32x16xf32>
    %c0_31 = arith.constant 0 : index
    %c130 = arith.constant 130 : index
    %40 = vector.load %arg4[%c0_31, %c130] : memref<32x146xf32, #tpu.memory_space<vmem>>, vector<32x16xf32>
    %cst_32 = arith.constant 0.054488685 : f32
    %41 = vector.broadcast %cst_32 : f32 to vector<32x16xf32>
    %42 = arith.mulf %41, %40 : vector<32x16xf32>
    %43 = arith.addf %39, %42 : vector<32x16xf32>
    %c0_33 = arith.constant 0 : index
    %c0_34 = arith.constant 0 : index
    %44 = vector.load %arg5[%c0_33, %c0_34] : memref<32x16xf32, #tpu.memory_space<vmem>>, vector<32x16xf32>
    tpu.vector_store %arg5[%c0_33, %c0_34], %43 {strides = array<i32>} : memref<32x16xf32, #tpu.memory_space<vmem>>, vector<32x16xf32>,
    %cst_35 = arith.constant 0.000000e+00 : f32
    %45 = vector.broadcast %cst_35 : f32 to vector<16x16xf32>
    %c6 = arith.constant 6 : index
    %c0_36 = arith.constant 0 : index
    %46 = vector.load %arg5[%c6, %c0_36] : memref<32x16xf32, #tpu.memory_space<vmem>>, vector<16x16xf32>
    %cst_37 = arith.constant 0.054488685 : f32
    %47 = vector.broadcast %cst_37 : f32 to vector<16x16xf32>
    %48 = arith.mulf %47, %46 : vector<16x16xf32>
    %49 = arith.addf %45, %48 : vector<16x16xf32>
    %c7 = arith.constant 7 : index
    %c0_38 = arith.constant 0 : index
    %50 = vector.load %arg5[%c7, %c0_38] : memref<32x16xf32, #tpu.memory_space<vmem>>, vector<16x16xf32>
    %cst_39 = arith.constant 0.244201347 : f32
    %51 = vector.broadcast %cst_39 : f32 to vector<16x16xf32>
    %52 = arith.mulf %51, %50 : vector<16x16xf32>
    %53 = arith.addf %49, %52 : vector<16x16xf32>
    %c8_40 = arith.constant 8 : index
    %c0_41 = arith.constant 0 : index
    %54 = vector.load %arg5[%c8_40, %c0_41] : memref<32x16xf32, #tpu.memory_space<vmem>>, vector<16x16xf32>
    %cst_42 = arith.constant 0.402619958 : f32
    %55 = vector.broadcast %cst_42 : f32 to vector<16x16xf32>
    %56 = arith.mulf %55, %54 : vector<16x16xf32>
    %57 = arith.addf %53, %56 : vector<16x16xf32>
    %c9 = arith.constant 9 : index
    %c0_43 = arith.constant 0 : index
    %58 = vector.load %arg5[%c9, %c0_43] : memref<32x16xf32, #tpu.memory_space<vmem>>, vector<16x16xf32>
    %cst_44 = arith.constant 0.244201347 : f32
    %59 = vector.broadcast %cst_44 : f32 to vector<16x16xf32>
    %60 = arith.mulf %59, %58 : vector<16x16xf32>
    %61 = arith.addf %57, %60 : vector<16x16xf32>
    %c10 = arith.constant 10 : index
    %c0_45 = arith.constant 0 : index
    %62 = vector.load %arg5[%c10, %c0_45] : memref<32x16xf32, #tpu.memory_space<vmem>>, vector<16x16xf32>
    %cst_46 = arith.constant 0.054488685 : f32
    %63 = vector.broadcast %cst_46 : f32 to vector<16x16xf32>
    %64 = arith.mulf %63, %62 : vector<16x16xf32>
    %65 = arith.addf %61, %64 : vector<16x16xf32>
    %66 = arith.subf %13, %65 : vector<16x16xf32>
    %67 = math.absf %66 : vector<16x16xf32>
    %c0_47 = arith.constant 0 : index
    %c0_48 = arith.constant 0 : index
    %c0_49 = arith.constant 0 : index
    %c0_50 = arith.constant 0 : index
    %68 = vector.load %arg3[%c0_47, %c0_48, %c0_49, %c0_50] : memref<1x1x16x16xf32, #tpu.memory_space<vmem>>, vector<1x1x16x16xf32>
    %69 = vector.shape_cast %68 : vector<1x1x16x16xf32> to vector<16x16xf32>
    %70 = vector.shape_cast %67 : vector<16x16xf32> to vector<1x1x16x16xf32>
    tpu.vector_store %arg3[%c0_47, %c0_48, %c0_49, %c0_50], %70 {strides = array<i32>} : memref<1x1x16x16xf32, #tpu.memory_space<vmem>>, vector<1x1x16x16xf32>,
    return
  }
  func.func @transform_0(%arg0: i32, %arg1: i32) -> (i32, i32, i32, i32) {
    %c0_i32 = arith.constant 0 : i32
    %c0_i32_0 = arith.constant 0 : i32
    %c0_i32_1 = arith.constant 0 : i32
    return %arg0, %c0_i32, %arg1, %c0_i32_0 : i32, i32, i32, i32
  }
  func.func @transform_1(%arg0: i32, %arg1: i32) -> (i32, i32, i32, i32) {
    %c0_i32 = arith.constant 0 : i32
    %c0_i32_0 = arith.constant 0 : i32
    %c0_i32_1 = arith.constant 0 : i32
    return %arg0, %c0_i32, %arg1, %c0_i32_0 : i32, i32, i32, i32
  }
}

</mosaic_0001>

<bundles_post_ra>
// kernel: tpu_custom_call.1
= control target key start
LH: loop header
LB: loop body
LE: loop exit
PB: predicated region body
PF: predicated region fallthrough
CT: control target
= control target key end

     0   :  { %6 = vsyncpa [#allocation5], 0  ;;  %s946_s0 = inlined_call_operand.hbm [shape: f32[2,3,16,16], index: 0, kind: input, shape index: {}]   ;;  %s947_s1 = inlined_call_operand.hbm [shape: f32[2,1,16,16], index: 1, kind: output, shape index: {}]  }
   0x1   :  { %8 = vsyncpa [#allocation5 + $0x1], 0 }
   0x2   :  { %9 = vsyncpa [#allocation6], 0 }
   0x3   :  { %11 = vsyncpa [#allocation6 + $0x1], 0  ;;  %s737_s6 = smov 0   ;;  %s739_s7 = smov 0  }
   0x4   :  { %s741_s8 = smov 0   ;;  %s743_s9 = smov 0  }
   0x5   :  { %s745_s10 = smov 0   ;;  %s747_s11 = smov 0  }
   0x6 LB: > { %s513_s12 = sadd.s32 4294967295, %s713_s11   ;;  %s514_s13 = sadd.s32 4294967294, %s713_s11   ;;  %s713_s11 = sphi %s747_s11, %s17_s11   ;;  %s709_s10 = sphi %s745_s10, %s958_s10   ;;  %s705_s9 = sphi %s743_s9, %s957_s9   ;;  %s701_s8 = sphi %s741_s8, %s956_s8   ;;  %s697_s7 = sphi %s739_s7, %s955_s7   ;;  %s693_s6 = sphi %s737_s6, %s954_s6  }
   0x7   : > { %s29_s14 = sadd.s32 1, %s709_s10  ;;  %s38_s15 = sadd.s32 1, %s701_s8 }
   0x8   : > { %p31_p0 = scmp.ge.s32.totalorder %s29_s14, 2  ;;  %p45_p1 = scmp.ne.s32.totalorder %s701_s8, %s697_s7 }
   0x9   : > { %p46_p2 = scmp.eq.s32.totalorder %s713_s11, 0  ;;  %p51_p3 = scmp.ne.s32.totalorder %s697_s7, %s693_s6 }
   0xa   : > { %s960_s14 = smov (%p31_p0, %s29_s14), 0  ;;  %p52_p5 = scmp.eq.s32.totalorder %s513_s12, 0 }
   0xb   : > { %p778_p4 = por %p46_p2, %p45_p1  ;;  %s33_s17 = ssub.s32 %s709_s10, %s960_s14 }
   0xc   : > { %p77_p6 = scmp.eq.s32.totalorder %s513_s12, 1  ;;  %p36_p7 = scmp.eq.s32.totalorder %s33_s17, 0 }
   0xd   : > { %p784_p8 = por %p52_p5, %p51_p3  ;;  %p83_p10 = scmp.eq.s32.totalorder %s514_s13, 1 }
   0xe   : > { %p788_p9 = por %p77_p6, %p45_p1  ;;  %p545_p13 = scmp.lt.s32.totalorder %s713_s11, 2 }
   0xf   : > { %s793_s20 = scalar_select %p36_p7, %s701_s8, %s38_s15  }
  0x10   : > { %p795_p11 = por %p83_p10, %p51_p3  ;;  %s103_s22 = sand.u32 1, %s701_s8  }
  0x11   : > { %s530_s23 = smul.u32 48, %s103_s22  ;;  %p805_p0 = pnand %p545_p13, %p778_p4 }
  0x12   : > { %s531_s24 = smul.u32 768, %s709_s10  ;;  %p518_p1 = scmp.ge.s32.totalorder %s713_s11, 1 }
  0x13   : > { %s107_s29 = scalar_lea.vmem [#allocation4], %s530_s23  ;;  %s104_s2 = scalar_lea.sflag [#allocation5], %s103_s22 }
  0x14   : > { %s115_s28 = scalar_lea.hbm %s946_s0, %s531_s24  ;;  %s116_s30 = sshll.u32 %s107_s29, 4  ;;  %s117_s30 = int_to_ptr.vmem [resolvable:$true] %s116_s30 }
  0x15   : > { %p607_p2 = pneg %p805_p0  ;;  %s618_s3 = scalar_lea.vmem %s117_s30, 768 }
  0x16   : > { %p619_p3 = scmp.ne.s32.totalorder %s117_s30, %s618_s3  ;;  %s715_s4 = smov [#allocation4]  }
  0x17   : > { %s623_s5 = sshll.u32 %s715_s4, 4  ;;  %s624_s5 = int_to_ptr.vmem [resolvable:$false] %s623_s5 }
  0x18   : > { %p621_p5 = pnand %p619_p3, %p607_p2  ;;  %s625_s12 = scalar_lea.vmem %s624_s5, 1536 }
  0x19   : > { %p626_p4 = scmp.lt.s32.totalorder %s117_s30, %s624_s5  ;;  %p627_p7 = scmp.lt.s32.totalorder %s625_s12, %s618_s3 }
  0x1a   : > { %p622_p6 = pneg %p621_p5 }
  0x1b   : > { %p628_p10 = por %p627_p7, %p626_p4 }
  0x1d   : > { %p629_p13 = pnand %p628_p10, %p622_p6 }
  0x1f   : > { %632 = shalt.err (!%p629_p13)
}
  0x20   : > { %s716_s13 = smov 128   ;;  %s717_s15 = smov 8  }
  0x21   : > { %540 = dma.hbm_to_vmem [thread:$0]  (!%p805_p0), %s115_s28, 768, %s117_s30, %s104_s2, %s716_s13, %s716_s13, %s717_s15  }
  0x22   : > { %p124_p12 = scmp.lt.s32.totalorder %s713_s11, 3 }
  0x24   : > { %p125_p2 = pnand %p518_p1, %p124_p12 }
  0x25   : > { %s821_s16 = sand.u32 (!%p125_p2), 1, %s697_s7  }
  0x26   : > { %128 = sbr.rel (%p125_p2) target bundleno = 361 (0x169), region = 24  ;;  %s131_s22 = scalar_lea.sflag (!%p125_p2), [#allocation5], %s821_s16 }
  0x27   : > { %s532_s17 = smul.u32 (!%p125_p2), 48, %s821_s16 }
  0x29   : > { %s825_s23 = scalar_lea.vmem (!%p125_p2), [#allocation4], %s532_s17 }
  0x2b   : > { %684 = dma.done.wait (%p784_p8), %s131_s22, 768  }
  0x2c   : > { %686 = vsyncadd (%p784_p8), %s131_s22, 4294966528  ;;  %vm178_vm0 = vcmask 1048560   ;;  %vm173_vm1 = vcmask 130048   ;;  %vm183_vm2 = vcmask 146560   ;;  %v718_v0 = vmov 0.0   ;;  %v155_v1 = vld [vmem:[%s825_s23] sm:$0xff] }
  0x2d   : > { %179 = vst.msk [vmem:[#allocation2] sm:$0xff] %vm178_vm0, %v718_v0  ;;  %180 = vst.msk [vmem:[#allocation2 + $0x10] sm:$0xff] %vm178_vm0, %v718_v0  ;;  %v520_v7 = vld [vmem:[%s825_s23 + $0x10] sm:$0xff]  ;;  %v522_v8 = vld [vmem:[%s825_s23 + $0x20] sm:$0xff]  ;;  %v157_v10 = vmul.f32 0.299, %v155_v1 }
  0x2e   : > { %181 = vst.msk [vmem:[#allocation2 + $0x20] sm:$0xff] %vm178_vm0, %v718_v0  ;;  %182 = vst.msk [vmem:[#allocation2 + $0x30] sm:$0xff] %vm178_vm0, %v718_v0  ;;  %s719_s18 = smov 127   ;;  %v162_v14 = vmul.f32 0.587, %v520_v7  ;;  %v156_v16 = vld [vmem:[%s825_s23 + $0x8] sm:$0xff] }
  0x2f   : > { %176 = vst.msk [vmem:[#allocation2 + $0x8] sm:$0xff] %vm173_vm1, %v718_v0  ;;  %177 = vst.msk [vmem:[#allocation2 + $0x38] sm:$0xff] %vm173_vm1, %v718_v0  ;;  %v169_v15 = vmul.f32 0.114, %v522_v8  ;;  %v158_v17 = vmul.f32 0.299, %v156_v16 }
  0x30   : > { %184 = vst.msk [vmem:[#allocation2 + $0x8] sm:$0xff] %vm183_vm2, %v718_v0  ;;  %187 = vst.msk [vmem:[#allocation2 + $0x38] sm:$0xff] %vm183_vm2, %v718_v0  ;;  %v521_v18 = vld [vmem:[%s825_s23 + $0x18] sm:$0xff]  ;;  %v523_v19 = vld [vmem:[%s825_s23 + $0x28] sm:$0xff]  ;;  %v164_v20 = vadd.f32 %v162_v14, %v157_v10  ;;  %s720_s24 = smov 125   ;;  %s721_s25 = smov 126  }
  0x31   : > { %v163_v21 = vmul.f32 0.587, %v521_v18  ;;  %v170_v22 = vmul.f32 0.114, %v523_v19  ;;  %s722_s26 = smov 124   ;;  %vm244_vm3 = vcmask 1039360  }
  0x32   : > { %v857_v24 = vadd.f32 %v169_v15, %v164_v20  ;;  %s723_s27 = smov 2   ;;  %vm361_vm4 = vcmask 15360   ;;  %s519_s28 = sshll.u32 %s821_s16, 4 }
  0x33   : > { %v165_v25 = vadd.f32 %v163_v21, %v158_v17  ;;  %s529_s29 = sshll.u32 %s705_s9, 8  ;;  %s152_s30 = scalar_lea.vmem [#allocation7], %s519_s28 }
  0x34   : > { %v836_v2 = vld [vmem:[#allocation2] sm:$0xff]  ;;  %v838_v3 = vld [vmem:[#allocation2 + $0x10] sm:$0xff]  ;;  %174 = vst.msk [vmem:[#allocation2 + $0x18] sm:$0xff] %vm173_vm1, %v857_v24  ;;  %s426_s2 = sshll.u32 %s152_s30, 4  ;;  %s894_s5 = scalar_lea.hbm %s947_s1, %s529_s29  ;;  %s896_s2 = int_to_ptr.vmem [resolvable:$true] %s426_s2 }
  0x35   : > { %v840_v4 = vld [vmem:[#allocation2 + $0x20] sm:$0xff]  ;;  %v212_v5 = vmul.f32 0.24420135, %v836_v2  ;;  %v214_v6 = vmul.f32 0.24420135, %v838_v3  ;;  %v846_v9 = vld [vmem:[#allocation2 + $0x30] sm:$0xff]  ;;  %v861_v26 = vadd.f32 %v170_v22, %v165_v25 }
  0x36   : > { %v216_v11 = vmul.f32 0.24420135, %v840_v4  ;;  %v218_v12 = vmul.f32 0.24420135, %v846_v9  ;;  %185 = vst.msk [vmem:[#allocation2 + $0x18] sm:$0xff] %vm183_vm2, %v718_v0  ;;  %s411_s9 = scalar_lea.sflag [#allocation6], %s821_s16 }
  0x37   : > { %228 = vrot.lane.b32.xlu0 %v212_v5, %s719_s18  ;;  %232 = vrot.lane.b32.xlu1 %v214_v6, %s719_s18  ;;  %v189_v13 = vld [vmem:[#allocation2 + $0x8] sm:$0xff]  ;;  %v195_v28 = vld [vmem:[#allocation2 + $0x38] sm:$0xff]  ;;  %175 = vst.msk [vmem:[#allocation2 + $0x28] sm:$0xff] %vm173_vm1, %v861_v26  ;;  %v196_v51 = vmul.f32 0.054488685, %v836_v2  ;;  %s633_s12 = scalar_lea.vmem %s896_s2, 256 }
  0x38   : > { %v213_v23 = vmul.f32 0.24420135, %v189_v13  ;;  %v265_v27 = vmul.f32 0.40261996, %v189_v13  ;;  %186 = vst.msk [vmem:[#allocation2 + $0x28] sm:$0xff] %vm183_vm2, %v718_v0  ;;  %p634_p8 = scmp.ne.s32.totalorder %s896_s2, %s633_s12  ;;  %s724_s13 = smov [#allocation7]  }
  0x39   : > { %v219_v29 = vmul.f32 0.24420135, %v195_v28  ;;  %v268_v36 = vmul.f32 0.40261996, %v195_v28  ;;  %v197_v38 = vmul.f32 0.054488685, %v189_v13 }
  0x3a   : > { %v203_v40 = vmul.f32 0.054488685, %v195_v28  ;;  %v198_v58 = vmul.f32 0.054488685, %v838_v3  ;;  %v200_v5 = vmul.f32 0.054488685, %v840_v4  ;;  %p635_p12 = pnand %p634_p8, %p788_p9 }
  0x3b   : > { %236 = vrot.lane.b32.xlu0 %v216_v11, %s719_s18  ;;  %240 = vrot.lane.b32.xlu1 %v218_v12, %s719_s18  ;;  %v202_v11 = vmul.f32 0.054488685, %v846_v9  ;;  %s637_s15 = sshll.u32 %s724_s13, 4  ;;  %s638_s15 = int_to_ptr.vmem [resolvable:$false] %s637_s15 }
  0x3c   : > { %p636_p0 = pneg %p635_p12  ;;  %s639_s17 = scalar_lea.vmem %s638_s15, 512 }
  0x3d   : > { %v191_v30 = vld [vmem:[#allocation2 + $0x18] sm:$0xff]  ;;  %p640_p1 = scmp.lt.s32.totalorder %s896_s2, %s638_s15  ;;  %p641_p3 = scmp.lt.s32.totalorder %s639_s17, %s633_s12 }
  0x3e   : > { %v215_v31 = vmul.f32 0.24420135, %v191_v30  ;;  %v266_v35 = vmul.f32 0.40261996, %v191_v30  ;;  %v199_v37 = vmul.f32 0.054488685, %v191_v30 }
  0x3f   : > { %230 = vrot.lane.b32.xlu0 %v213_v23, %s719_s18  ;;  %293 = vrot.lane.b32.xlu1 %v213_v23, %s720_s24  ;;  %v193_v32 = vld [vmem:[#allocation2 + $0x28] sm:$0xff]  ;;  %p642_p5 = por %p641_p3, %p640_p1 }
  0x40   : > { %v217_v33 = vmul.f32 0.24420135, %v193_v32  ;;  %v267_v34 = vmul.f32 0.40261996, %v193_v32  ;;  %v201_v39 = vmul.f32 0.054488685, %v193_v32 }
  0x41   : > { %p643_p6 = pnand %p642_p5, %p636_p0 }
  0x43   : > { %273 = vrot.lane.b32.xlu0 %v265_v27, %s721_s25  ;;  %234 = vrot.lane.b32.xlu1 %v215_v31, %s719_s18 }
  0x47   : > { %242 = vrot.lane.b32.xlu0 %v219_v29, %s719_s18  ;;  %238 = vrot.lane.b32.xlu1 %v217_v33, %s719_s18 }
  0x4b   : > { %277 = vrot.lane.b32.xlu0 %v267_v34, %s721_s25  ;;  %275 = vrot.lane.b32.xlu1 %v266_v35, %s721_s25 }
  0x4f   : > { %295 = vrot.lane.b32.xlu0 %v215_v31, %s720_s24  ;;  %297 = vrot.lane.b32.xlu1 %v217_v33, %s720_s24 }
  0x53   : > { %279 = vrot.lane.b32.xlu0 %v268_v36, %s721_s25  ;;  %317 = vrot.lane.b32.xlu1 %v197_v38, %s722_s26 }
  0x57   : > { %319 = vrot.lane.b32.xlu0 %v199_v37, %s722_s26  ;;  %321 = vrot.lane.b32.xlu1 %v201_v39, %s722_s26 }
  0x5b   : > { %299 = vrot.lane.b32.xlu0 %v219_v29, %s720_s24  ;;  %323 = vrot.lane.b32.xlu1 %v203_v40, %s722_s26 }
  0xa9   : > { %v229_v41 = vpop.permute.xlu0 %228  ;;  %v233_v42 = vpop.permute.xlu1 %232 }
  0xad   : > { %v237_v43 = vpop.permute.xlu0 %236  ;;  %v241_v44 = vpop.permute.xlu1 %240 }
  0xb1   : > { %v231_v45 = vpop.permute.xlu0 %230  ;;  %v294_v46 = vpop.permute.xlu1 %293 }
  0xb2   : > { %v245_v52 = vsel %vm244_vm3, %v229_v41, %v231_v45  ;;  %v258_v56 = vadd.f32 %v231_v45, %v197_v38 }
  0xb3   : > { %v257_v55 = vadd.f32 %v245_v52, %v196_v51 }
  0xb5   : > { %v274_v47 = vpop.permute.xlu0 %273  ;;  %v235_v49 = vpop.permute.xlu1 %234 }
  0xb6   : > { %v246_v59 = vsel %vm244_vm3, %v233_v42, %v235_v49  ;;  %v285_v61 = vadd.f32 %v274_v47, %v257_v55  ;;  %v286_v62 = vadd.f32 %v274_v47, %v258_v56  ;;  %v260_v1 = vadd.f32 %v235_v49, %v199_v37 }
  0xb7   : > { %v259_v0 = vadd.f32 %v246_v59, %v198_v58 }
  0xb8   : > { %v305_v8 = vadd.f32 %v294_v46, %v285_v61  ;;  %v306_v10 = vadd.f32 %v294_v46, %v286_v62 }
  0xb9   : > { %v243_v48 = vpop.permute.xlu0 %242  ;;  %v239_v53 = vpop.permute.xlu1 %238 }
  0xba   : > { %v247_v2 = vsel %vm244_vm3, %v237_v43, %v239_v53  ;;  %v248_v3 = vsel %vm244_vm3, %v241_v44, %v243_v48  ;;  %v262_v15 = vadd.f32 %v239_v53, %v201_v39  ;;  %v264_v20 = vadd.f32 %v243_v48, %v203_v40 }
  0xbb   : > { %v261_v14 = vadd.f32 %v247_v2, %v200_v5  ;;  %v263_v4 = vadd.f32 %v248_v3, %v202_v11 }
  0xbd   : > { %v278_v50 = vpop.permute.xlu0 %277  ;;  %v276_v57 = vpop.permute.xlu1 %275 }
  0xbe   : > { %v287_v6 = vadd.f32 %v276_v57, %v259_v0  ;;  %v288_v7 = vadd.f32 %v276_v57, %v260_v1  ;;  %v289_v22 = vadd.f32 %v278_v50, %v261_v14  ;;  %v290_v23 = vadd.f32 %v278_v50, %v262_v15 }
  0xc1   : > { %v296_v54 = vpop.permute.xlu0 %295  ;;  %v298_v63 = vpop.permute.xlu1 %297 }
  0xc2   : > { %v307_v18 = vadd.f32 %v296_v54, %v287_v6  ;;  %v308_v19 = vadd.f32 %v296_v54, %v288_v7  ;;  %v309_v29 = vadd.f32 %v298_v63, %v289_v22  ;;  %v310_v30 = vadd.f32 %v298_v63, %v290_v23 }
  0xc5   : > { %v280_v60 = vpop.permute.xlu0 %279  ;;  %v318_v12 = vpop.permute.xlu1 %317 }
  0xc6   : > { %v329_v16 = vadd.f32 %v318_v12, %v305_v8  ;;  %v330_v17 = vadd.f32 %v318_v12, %v306_v10  ;;  %v291_v27 = vadd.f32 %v280_v60, %v263_v4  ;;  %v292_v31 = vadd.f32 %v280_v60, %v264_v20 }
  0xc8   : > { %347 = vrot.lane.b32.xlu1 %v330_v17, %s723_s27  ;;  %345 = vrot.lane.b32.xlu0 %v329_v16, %s723_s27 }
  0xc9   : > { %v320_v13 = vpop.permute.xlu0 %319  ;;  %v322_v21 = vpop.permute.xlu1 %321 }
  0xca   : > { %v331_v25 = vadd.f32 %v320_v13, %v307_v18  ;;  %v332_v9 = vadd.f32 %v320_v13, %v308_v19  ;;  %v333_v32 = vadd.f32 %v322_v21, %v309_v29  ;;  %v334_v33 = vadd.f32 %v322_v21, %v310_v30 }
  0xcc   : > { %349 = vrot.lane.b32.xlu0 %v331_v25, %s723_s27  ;;  %351 = vrot.lane.b32.xlu1 %v332_v9, %s723_s27 }
  0xcd   : > { %v300_v28 = vpop.permute.xlu0 %299  ;;  %v324_v36 = vpop.permute.xlu1 %323 }
  0xce   : > { %v311_v34 = vadd.f32 %v300_v28, %v291_v27  ;;  %v312_v35 = vadd.f32 %v300_v28, %v292_v31 }
  0xd0   : > { %353 = vrot.lane.b32.xlu0 %v333_v32, %s723_s27  ;;  %355 = vrot.lane.b32.xlu1 %v334_v33, %s723_s27  ;;  %v335_v37 = vadd.f32 %v324_v36, %v311_v34  ;;  %v336_v38 = vadd.f32 %v324_v36, %v312_v35 }
  0xd4   : > { %357 = vrot.lane.b32.xlu0 %v335_v37, %s723_s27  ;;  %359 = vrot.lane.b32.xlu1 %v336_v38, %s723_s27 }
 0x13a   : > { %v348_v39 = vpop.permute.xlu1 %347  ;;  %v346_v40 = vpop.permute.xlu0 %345 }
 0x13b   : > { %v362_v41 = vsel %vm361_vm4, %v346_v40, %v348_v39 }
 0x13c   : > { %370 = vst.msk [vmem:[#allocation3] sm:$0xff] %vm173_vm1, %v362_v41 }
 0x13e   : > { %v350_v42 = vpop.permute.xlu0 %349  ;;  %v352_v43 = vpop.permute.xlu1 %351 }
 0x13f   : > { %v363_v44 = vsel %vm361_vm4, %v350_v42, %v352_v43 }
 0x140   : > { %371 = vst.msk [vmem:[#allocation3 + $0x8] sm:$0xff] %vm173_vm1, %v363_v44 }
 0x142   : > { %v354_v45 = vpop.permute.xlu0 %353  ;;  %v356_v46 = vpop.permute.xlu1 %355 }
 0x143   : > { %v364_v47 = vsel %vm361_vm4, %v354_v45, %v356_v46 }
 0x144   : > { %372 = vst.msk [vmem:[#allocation3 + $0x10] sm:$0xff] %vm173_vm1, %v364_v47 }
 0x146   : > { %v358_v48 = vpop.permute.xlu0 %357  ;;  %v360_v49 = vpop.permute.xlu1 %359 }
 0x147   : > { %v365_v50 = vsel %vm361_vm4, %v358_v48, %v360_v49  ;;  %v374_v51 = vld [vmem:[#allocation3 + $0x6] sm:$0xff] }
 0x148   : > { %v380_v52 = vld [vmem:[#allocation3 + $0x7] sm:$0xff]  ;;  %373 = vst.msk [vmem:[#allocation3 + $0x18] sm:$0xff] %vm173_vm1, %v365_v50  ;;  %v376_v54 = vmul.f32 0.054488685, %v374_v51 }
 0x149   : > { %v386_v53 = vld [vmem:[#allocation3 + $0x8] sm:$0xff]  ;;  %v382_v55 = vmul.f32 0.24420135, %v380_v52 }
 0x14a   : > { %v388_v57 = vmul.f32 0.40261996, %v386_v53 }
 0x14b   : > { %v384_v56 = vadd.f32 %v382_v55, %v376_v54  ;;  %v375_v58 = vld [vmem:[#allocation3 + $0xe] sm:$0xff] }
 0x14c   : > { %v381_v59 = vld [vmem:[#allocation3 + $0xf] sm:$0xff]  ;;  %v377_v61 = vmul.f32 0.054488685, %v375_v58 }
 0x14d   : > { %v387_v60 = vld [vmem:[#allocation3 + $0x10] sm:$0xff]  ;;  %v383_v62 = vmul.f32 0.24420135, %v381_v59  ;;  %v390_v63 = vadd.f32 %v388_v57, %v384_v56 }
 0x14e   : > { %v392_v0 = vld [vmem:[#allocation3 + $0x9] sm:$0xff]  ;;  %v389_v2 = vmul.f32 0.40261996, %v387_v60 }
 0x14f   : > { %v398_v1 = vld [vmem:[#allocation3 + $0xa] sm:$0xff]  ;;  %v385_v5 = vadd.f32 %v383_v62, %v377_v61  ;;  %v394_v6 = vmul.f32 0.24420135, %v392_v0  ;;  %v399_v8 = vld [vmem:[#allocation3 + $0x12] sm:$0xff] }
 0x150   : > { %v393_v7 = vld [vmem:[#allocation3 + $0x11] sm:$0xff]  ;;  %v400_v12 = vmul.f32 0.054488685, %v398_v1  ;;  %v401_v14 = vmul.f32 0.054488685, %v399_v8 }
 0x151   : > { %v391_v10 = vadd.f32 %v389_v2, %v385_v5  ;;  %v395_v11 = vmul.f32 0.24420135, %v393_v7  ;;  %v396_v3 = vadd.f32 %v394_v6, %v390_v63 }
 0x153   : > { %v397_v13 = vadd.f32 %v395_v11, %v391_v10  ;;  %v402_v15 = vadd.f32 %v400_v12, %v396_v3 }
 0x155   : > { %v403_v16 = vadd.f32 %v401_v14, %v397_v13  ;;  %v404_v17 = vsub.f32 %v857_v24, %v402_v15 }
 0x157   : > { %v405_v18 = vsub.f32 %v861_v26, %v403_v16  ;;  %v406_v19 = vand.u32 2147483647, %v404_v17 }
 0x159   : > { %v407_v4 = vand.u32 2147483647, %v405_v18  ;;  %408 = vst.msk [vmem:[%s152_s30] sm:$0xff] %vm173_vm1, %v406_v19 }
 0x15b   : > { %409 = vst.msk [vmem:[%s152_s30 + $0x8] sm:$0xff] %vm173_vm1, %v407_v4 }
 0x15c   : > { %646 = shalt.err (!%p643_p6)
}
 0x15d   : > { %s647_s22 = scalar_lea.hbm %s894_s5, 256  ;;  %s651_s24 = scalar_lea.hbm %s947_s1, 512 }
 0x15e   : > { %p648_p4 = scmp.ne.s32.totalorder %s894_s5, %s647_s22  ;;  %p652_p13 = scmp.lt.s32.totalorder %s894_s5, %s947_s1 }
 0x15f   : > { %p653_p2 = scmp.lt.s32.totalorder %s651_s24, %s647_s22 }
 0x160   : > { %p649_p7 = pnand %p648_p4, %p788_p9 }
 0x161   : > { %p654_p8 = por %p653_p2, %p652_p13 }
 0x162   : > { %p650_p10 = pneg %p649_p7 }
 0x164   : > { %p655_p12 = pnand %p654_p8, %p650_p10 }
 0x166   : > { %658 = shalt.err (!%p655_p12)
}
 0x167   : > { %s725_s27 = smov 128   ;;  %s726_s28 = smov 8  }
 0x168   : > { %535 = dma.vmem_to_hbm [thread:$0]  (%p788_p9), %s896_s2, 256, %s894_s5, %s411_s9, %s725_s27, %s725_s27, %s726_s28  }
 0x169 PF: > { %s441_s29 = sand.u32 1, %s693_s6   ;;  %p953_p0 = scmp.ge.s32.totalorder %s713_s11, 2 }
 0x16a   : > { %s442_s30 = scalar_lea.sflag [#allocation6], %s441_s29 }
 0x16b   : > { %p542_p1 = pnand %p953_p0, %p795_p11 }
 0x16d   : > { %p543_p3 = pneg %p542_p1 }
 0x16f   : > { %688 = dma.done.wait (%p543_p3), %s442_s30, 256  }
 0x170   : > { %690 = vsyncadd (%p543_p3), %s442_s30, 4294967040  ;;  %s17_s11 = sadd.s32 1, %s713_s11   ;;  %s954_s6 = smov %s697_s7 }
 0x171   : > { %p14_p5 = scmp.ge.s32.totalorder %s17_s11, 4   ;;  %s955_s7 = smov %s701_s8 }
 0x172   : > { %s956_s8 = smov %s793_s20  ;;  %s957_s9 = smov %s709_s10 }
 0x173   : > { %s958_s10 = smov %s960_s14  ;;  %16 = sbr.rel (!%p14_p5) target bundleno = 6 (0x6), region = 71 }
 0x178   :  { %447 = vsyncpa [#allocation5], 1 }
 0x179   :  { %449 = vsyncpa [#allocation5 + $0x1], 1 }
 0x17a   :  { %450 = vsyncpa [#allocation6], 1 }
 0x17b   :  { %452 = vsyncpa [#allocation6 + $0x1], 1 }

</bundles_post_ra>
